<compile_context>
chip_gen: v7x
topology: tpu7x:2x2x1
jax: 0.10.0
libtpu: 0.0.40
codegen_flags: <defaults>
</compile_context>

<pallas_src>
import jax
import jax.numpy as jnp
from jax.experimental import pallas as pl
from jax.experimental.pallas import tpu as pltpu


def _h_sigmoid_kernel(x_ref, o_ref):
    x = x_ref[...]
    if x.dtype in (jnp.float32, jnp.bfloat16):
        # Compute directly in the native dtype (bf16 VALU is native on v6e/v7x;
        # Mosaic handles the lowering on v5e). Python-float constants are weak
        # typed, so the dtype is preserved.
        y = jnp.clip(x + 3.0, 0.0, 6.0) * (1.0 / 6.0)
    else:
        xf = x.astype(jnp.float32)
        y = jnp.clip(xf + 3.0, 0.0, 6.0) * (1.0 / 6.0)
    o_ref[...] = y.astype(o_ref.dtype)


def h_sigmoid(x: jax.Array, *, tile_rows: int = 4096) -> jax.Array:
    """Elementwise h_sigmoid on an NCHW (or any-shape) array via Pallas."""
    orig_shape = x.shape
    orig_dtype = x.dtype
    total = x.size
    if total == 0:
        return x

    lane = 128
    itemsize = jnp.dtype(orig_dtype).itemsize
    # Sublane packing: f32 -> 8 rows/vreg, bf16 -> 16, int8/fp8 -> 32.
    row_unit = 8 * max(1, 4 // itemsize)

    # Only pad the flat length up to a multiple of 128 lanes (skipped entirely
    # when already aligned -> no extra HBM pass in the common case).
    x_flat = jnp.ravel(x)
    padded_total = pl.cdiv(total, lane) * lane
    needs_pad = padded_total != total
    if needs_pad:
        x_flat = jnp.pad(x_flat, (0, padded_total - total))
    rows = padded_total // lane
    x2d = x_flat.reshape(rows, lane)

    # Big tile, multiple of the dtype's sublane packing, capped at ~4 MiB per
    # buffer so double-buffered in+out (~16 MiB) fits every generation's VMEM
    # (incl. v7x's 64 MiB physical / 32 MiB scoped per TensorCore).
    max_rows_by_bytes = max(row_unit, (4 * 1024 * 1024) // (lane * itemsize))
    tr = min(tile_rows, rows, max_rows_by_bytes)
    tr = max(row_unit, (tr // row_unit) * row_unit)

    # cdiv grid: the last (partial) block is masked by Pallas, so odd row
    # counts keep the large tile instead of collapsing it.
    grid = (pl.cdiv(rows, tr),)

    tile_bytes = tr * lane * itemsize
    vmem_limit = min(64 * 1024 * 1024, max(32 * 1024 * 1024, 6 * tile_bytes))

    out2d = pl.pallas_call(
        _h_sigmoid_kernel,
        out_shape=jax.ShapeDtypeStruct((rows, lane), orig_dtype),
        grid_spec=pltpu.PrefetchScalarGridSpec(
            num_scalar_prefetch=0,
            grid=grid,
            in_specs=[pl.BlockSpec((tr, lane), lambda i: (i, 0))],
            out_specs=pl.BlockSpec((tr, lane), lambda i: (i, 0)),
        ),
        compiler_params=pltpu.CompilerParams(
            dimension_semantics=("parallel",),
            vmem_limit_bytes=vmem_limit,
        ),
    )(x2d)

    out_flat = out2d.reshape(-1)
    if needs_pad:
        out_flat = out_flat[:total]
    return out_flat.reshape(orig_shape)


def _ref_h_sigmoid(x):
    xf = x.astype(jnp.float32)
    return (jnp.clip(xf + 3.0, 0.0, 6.0) / 6.0).astype(x.dtype)


if __name__ == "__main__":
    key = jax.random.PRNGKey(0)

    # NCHW, same convention as the PyTorch module's typical usage.
    x = jax.random.normal(key, (2, 4, 16, 16), dtype=jnp.float32) * 4.0
    y = jax.block_until_ready(h_sigmoid(x))
    y_ref = _ref_h_sigmoid(x)
    assert y.shape == x.shape and y.dtype == x.dtype
    assert jnp.allclose(y, y_ref, atol=1e-6, rtol=1e-6)

    # Ragged size (not a multiple of 128) -> exercises the masked last block.
    k2 = jax.random.PRNGKey(1)
    x2 = jax.random.normal(k2, (3, 5, 7, 11), dtype=jnp.float32) * 4.0
    y2 = jax.block_until_ready(h_sigmoid(x2))
    assert jnp.allclose(y2, _ref_h_sigmoid(x2), atol=1e-6, rtol=1e-6)

    # bf16 path (native bf16 compute, 16-row sublane packing).
    x3 = (jax.random.normal(key, (2, 4, 16, 16), dtype=jnp.float32) * 4.0).astype(jnp.bfloat16)
    y3 = jax.block_until_ready(h_sigmoid(x3))
    assert y3.dtype == jnp.bfloat16
    assert jnp.allclose(y3.astype(jnp.float32),
                        _ref_h_sigmoid(x3).astype(jnp.float32),
                        atol=2e-2, rtol=2e-2)

    print("KERNEL_OK")
</pallas_src>

<mosaic_0001>
module attributes {stable_mosaic.version = 11 : i64} {
  func.func @_h_sigmoid_kernel(%arg0: i32, %arg1: memref<16x128xf32, #tpu.memory_space<vmem>>, %arg2: memref<16x128xf32, #tpu.memory_space<vmem>>) attributes {dimension_semantics = [#tpu.dimension_semantics<parallel>], iteration_bounds = array<i64: 1>, scalar_prefetch = 0 : i64, scratch_operands = 0 : i64, tpu.core_type = #tpu.core_type<tc>, window_params = [{transform_indices = @transform_0, window_bounds = array<i64: 16, 128>}, {transform_indices = @transform_1, window_bounds = array<i64: 16, 128>}]} {
    %c0 = arith.constant 0 : index
    %c0_0 = arith.constant 0 : index
    %0 = vector.load %arg1[%c0, %c0_0] : memref<16x128xf32, #tpu.memory_space<vmem>>, vector<16x128xf32>
    %cst = arith.constant 3.000000e+00 : f32
    %1 = vector.broadcast %cst : f32 to vector<16x128xf32>
    %2 = arith.addf %0, %1 : vector<16x128xf32>
    %cst_1 = arith.constant 0.000000e+00 : f32
    %cst_2 = arith.constant 6.000000e+00 : f32
    %3 = vector.broadcast %cst_1 : f32 to vector<16x128xf32>
    %4 = arith.maximumf %3, %2 : vector<16x128xf32>
    %5 = vector.broadcast %cst_2 : f32 to vector<16x128xf32>
    %6 = arith.minimumf %5, %4 : vector<16x128xf32>
    %cst_3 = arith.constant 0.166666672 : f32
    %7 = vector.broadcast %cst_3 : f32 to vector<16x128xf32>
    %8 = arith.mulf %6, %7 : vector<16x128xf32>
    %c0_4 = arith.constant 0 : index
    %c0_5 = arith.constant 0 : index
    %9 = vector.load %arg2[%c0_4, %c0_5] : memref<16x128xf32, #tpu.memory_space<vmem>>, vector<16x128xf32>
    tpu.vector_store %arg2[%c0_4, %c0_5], %8 {strides = array<i32>} : memref<16x128xf32, #tpu.memory_space<vmem>>, vector<16x128xf32>,
    return
  }
  func.func @transform_0(%arg0: i32) -> (i32, i32) {
    %c0_i32 = arith.constant 0 : i32
    %c0_i32_0 = arith.constant 0 : i32
    return %arg0, %c0_i32 : i32, i32
  }
  func.func @transform_1(%arg0: i32) -> (i32, i32) {
    %c0_i32 = arith.constant 0 : i32
    %c0_i32_0 = arith.constant 0 : i32
    return %arg0, %c0_i32 : i32, i32
  }
}

</mosaic_0001>

<bundles_post_ra>
// kernel: tpu_custom_call.1
= control target key start
LH: loop header
LB: loop body
LE: loop exit
PB: predicated region body
PF: predicated region fallthrough
CT: control target
= control target key end

     0   :  { %6 = vsyncpa [#allocation3], 0  ;;  %s148_s0 = inlined_call_operand.hbm [shape: f32[16,128], index: 0, kind: input, shape index: {}]   ;;  %s149_s1 = inlined_call_operand.hbm [shape: f32[16,128], index: 1, kind: output, shape index: {}]  }
   0x1   :  { %7 = vsyncpa [#allocation4], 0  ;;  %s104_s6 = smov [#allocation2]   ;;  %s56_s10 = scalar_lea.hbm %s148_s0, 256 }
   0x2   :  { %s13_s7 = sshll.u32 %s104_s6, 4  ;;  %p57_p0 = scmp.ne.s32.totalorder %s148_s0, %s56_s10  ;;  %s14_s7 = int_to_ptr.vmem [resolvable:$true] %s13_s7 }
   0x3   :  { %p60_p1 = scmp.lt.u32.totalorder %s56_s10, %s148_s0 }
   0x5   :  { %p62_p2 = pnand %p60_p1, %p57_p0 }
   0x7   :  { %65 = shalt.err (!%p62_p2)
}
   0x8   :  { %s66_s15 = scalar_lea.vmem %s14_s7, 256  ;;  %p71_p4 = scmp.lt.s32.totalorder %s14_s7, %s14_s7 }
   0x9   :  { %p67_p3 = scmp.ne.s32.totalorder %s14_s7, %s66_s15  ;;  %p72_p5 = scmp.lt.s32.totalorder %s66_s15, %s66_s15 }
   0xb   :  { %p73_p6 = por %p72_p5, %p71_p4 }
   0xd   :  { %p74_p7 = pnand %p73_p6, %p67_p3 }
   0xf   :  { %77 = shalt.err (!%p74_p7)
}
  0x10   :  { %s105_s16 = smov 128   ;;  %s106_s17 = smov 8  }
  0x11   :  { %19 = dma.hbm_to_vmem [thread:$0]  %s148_s0, 256, %s14_s7, [#allocation3], %s105_s16, %s105_s16, %s106_s17  }
  0x12   :  { %100 = dma.done.wait [#allocation3], 256  }
  0x13   :  { %101 = vsyncadd [#allocation3], 4294967040  ;;  %v23_v0 = vld [vmem:[#allocation2] sm:$0xff]  ;;  %v24_v1 = vld [vmem:[#allocation2 + $0x8] sm:$0xff]  ;;  %s107_s20 = smov [#allocation5]  }
  0x14   :  { %v25_v2 = vadd.f32 3.0, %v23_v0  ;;  %v26_v3 = vadd.f32 3.0, %v24_v1  ;;  %s40_s21 = sshll.u32 %s107_s20, 4  ;;  %s41_s21 = int_to_ptr.vmem [resolvable:$true] %s40_s21 }
  0x15   :  { %s78_s22 = scalar_lea.vmem %s41_s21, 256  ;;  %p83_p9 = scmp.lt.s32.totalorder %s41_s21, %s41_s21 }
  0x16   :  { %v27_v4 = vmax.f32 %v25_v2, 0.0  ;;  %v28_v5 = vmax.f32 %v26_v3, 0.0  ;;  %p79_p8 = scmp.ne.s32.totalorder %s41_s21, %s78_s22  ;;  %p84_p10 = scmp.lt.s32.totalorder %s78_s22, %s78_s22 }
  0x18   :  { %v29_v6 = vmin.f32 %v27_v4, 6.0  ;;  %v30_v7 = vmin.f32 %v28_v5, 6.0  ;;  %p85_p11 = por %p84_p10, %p83_p9 }
  0x1a   :  { %v31_v8 = vmul.f32 0.16666667, %v29_v6  ;;  %v32_v9 = vmul.f32 0.16666667, %v30_v7  ;;  %p86_p12 = pnand %p85_p11, %p79_p8 }
  0x1c   :  { %33 = vst [vmem:[#allocation5] sm:$0xff] %v31_v8  ;;  %34 = vst [vmem:[#allocation5 + $0x8] sm:$0xff] %v32_v9 }
  0x1d   :  { %89 = shalt.err (!%p86_p12)
}
  0x1e   :  { %s90_s24 = scalar_lea.hbm %s149_s1, 256 }
  0x1f   :  { %p91_p13 = scmp.ne.s32.totalorder %s149_s1, %s90_s24  ;;  %p94_p0 = scmp.lt.u32.totalorder %s90_s24, %s149_s1 }
  0x21   :  { %p96_p1 = pnand %p94_p0, %p91_p13 }
  0x23   :  { %99 = shalt.err (!%p96_p1)
}
  0x24   :  { %46 = dma.vmem_to_hbm [thread:$0]  %s41_s21, 256, %s149_s1, [#allocation4], %s105_s16, %s105_s16, %s106_s17  }
  0x25   :  { %102 = dma.done.wait [#allocation4], 256  }
  0x26   :  { %103 = vsyncadd [#allocation4], 4294967040 }
  0x27   :  { %50 = vsyncpa [#allocation3], 1 }
  0x28   :  { %51 = vsyncpa [#allocation4], 1 }

</bundles_post_ra>
